<compile_context>
chip_gen: v7x
topology: tpu7x:2x2x1
jax: 0.10.0
libtpu: 0.0.40
codegen_flags: <defaults>
</compile_context>

<pallas_src>
import functools

import jax
import jax.numpy as jnp
from jax.experimental import pallas as pl
from jax.experimental.pallas import tpu as pltpu


def _round_up(x, m):
    return ((x + m - 1) // m) * m


def _default_num_parallel():
    """2-way megacore split only on 2-TensorCore parts (v4 / v5p / v7x)."""
    try:
        kind = jax.devices()[0].device_kind.lower()
    except Exception:
        return 1
    if "lite" in kind or "v5e" in kind or "v6" in kind:
        return 1
    for tag in ("v7", "v5p", "v4"):
        if tag in kind:
            return 2
    return 1


def _value_loss_kernel(v_ref, z_ref, o_ref, acc_ref, *,
                       t_steps, tb, batch, inv_batch, needs_mask):
    # v_ref, z_ref: (C, TB) VMEM tiles (classes on sublanes, batch on lanes).
    # o_ref: (1, 1, 1) per-core partial output tile (already /batch).
    # acc_ref: (1, TB) f32 lane-wide accumulator, persists across the t axis.
    p = pl.program_id(0)
    t = pl.program_id(1)

    @pl.when(t == 0)
    def _init():
        acc_ref[...] = jnp.zeros_like(acc_ref)

    v = v_ref[...].astype(jnp.float32)           # (C, TB)
    z = z_ref[...].astype(jnp.float32)           # (C, TB)

    # Numerically stable log-sum-exp along the class (sublane) axis.
    m = jnp.max(v, axis=0, keepdims=True)        # (1, TB)
    shifted = v - m                              # (C, TB)
    lse = jnp.log(jnp.sum(jnp.exp(shifted), axis=0, keepdims=True))  # (1, TB)

    # batchloss = -sum_c z * (shifted - lse) = lse * sum(z) - sum(z * shifted)
    # (no (C, TB) logprobs temporary; no assumption that z sums to 1).
    sz = jnp.sum(z, axis=0, keepdims=True)                 # (1, TB)
    szv = jnp.sum(z * shifted, axis=0, keepdims=True)      # (1, TB)
    tile_loss = lse * sz - szv                             # (1, TB)

    if needs_mask:
        # Mask columns past the true batch size.  OOB lanes of an edge block
        # (and fully-clamped blocks) can hold arbitrary bits incl. NaN/Inf, so
        # select 0 explicitly instead of relying on z == 0.
        start = (p * t_steps + t) * tb
        col = start + jax.lax.broadcasted_iota(jnp.int32, tile_loss.shape, 1)
        tile_loss = jnp.where(col < batch, tile_loss, 0.0)

    # Lane-wide elementwise accumulate; cross-lane reduce deferred to finalize.
    acc_ref[...] += tile_loss

    @pl.when(t == pl.num_programs(1) - 1)
    def _finalize():
        o_ref[...] = (jnp.sum(acc_ref[...]) * inv_batch).reshape(1, 1, 1)


@functools.partial(jax.jit, static_argnames=("tile_b", "num_parallel"))
def value_loss(value, z, *, tile_b=131072, num_parallel=None):
    """Equivalent of ValueLoss.forward(value, z) (adjust=False, mean reduction)."""
    b = value.shape[0]
    v2 = value.reshape(b, -1)
    z2 = z.reshape(b, -1)
    assert v2.shape == z2.shape
    c = v2.shape[1]

    # Lane-dense layout: (C, B) with batch on the 128-lane axis.
    # TODO(synk): have the producer emit value / z already in (C, B) layout so
    # these transposes (the only remaining extra HBM pass) disappear.
    vt = v2.T
    zt = z2.T

    # Batch tile: multiple of 128, capped at the (rounded) batch so small
    # batches are a single grid step per core.
    tb = _round_up(min(tile_b, _round_up(b, 128)), 128)
    nblocks = pl.cdiv(b, tb)

    np_ = num_parallel if num_parallel is not None else _default_num_parallel()
    np_ = max(1, min(np_, nblocks))          # every core gets >= 1 real block
    t_steps = pl.cdiv(nblocks, np_)
    last_block = nblocks - 1
    # Static: mask only if the last tile is ragged or a shard runs past B.
    needs_mask = (b % tb != 0) or (np_ * t_steps != nblocks)

    # Clamp block indices so no block starts past the array; fully-clamped
    # blocks are zeroed by the in-kernel mask.
    in_map = lambda p, t: (0, jnp.minimum(p * t_steps + t, last_block))

    kernel = functools.partial(
        _value_loss_kernel,
        t_steps=t_steps, tb=tb, batch=b, inv_batch=1.0 / b,
        needs_mask=needs_mask)

    partials = pl.pallas_call(
        kernel,
        out_shape=jax.ShapeDtypeStruct((np_, 1, 1), jnp.float32),
        grid=(np_, t_steps),
        in_specs=[
            pl.BlockSpec((c, tb), in_map),
            pl.BlockSpec((c, tb), in_map),
        ],
        out_specs=pl.BlockSpec((1, 1, 1), lambda p, t: (p, 0, 0)),
        scratch_shapes=[pltpu.VMEM((1, tb), jnp.float32)],
        compiler_params=pltpu.CompilerParams(
            dimension_semantics=("parallel", "arbitrary"),
            vmem_limit_bytes=32 * 1024 * 1024,
        ),
    )(vt, zt)

    # Per-core partials are already normalized by 1/b; combine the <= 2 scalars.
    return jnp.sum(partials)


def _reference_value_loss(value, z):
    b = value.shape[0]
    v2 = value.reshape(b, -1).astype(jnp.float32)
    z2 = z.reshape(b, -1).astype(jnp.float32)
    logprobs = jax.nn.log_softmax(v2, axis=1)
    batchloss = -jnp.sum(z2 * logprobs, axis=1)
    return jnp.mean(batchloss)


if __name__ == "__main__":
    key = jax.random.PRNGKey(0)
    k_v, k_z, k_v2, k_z2 = jax.random.split(key, 4)

    # Test 1: small value-head shape (batch=8, 3 value classes: win/draw/loss).
    batch, num_classes = 8, 3
    value = jax.random.normal(k_v, (batch, num_classes), dtype=jnp.float32)
    z = jax.nn.softmax(
        jax.random.normal(k_z, (batch, num_classes), dtype=jnp.float32), axis=1)

    loss = jax.block_until_ready(value_loss(value, z))
    ref = jax.block_until_ready(_reference_value_loss(value, z))
    assert jnp.allclose(loss, ref, rtol=1e-4, atol=1e-5), (loss, ref)

    # Test 2: ragged batch exercising tiling, clamped block indices, in-kernel
    # masking, the cross-step accumulator and the 2-way parallel split.
    batch2 = 300
    value2 = jax.random.normal(k_v2, (batch2, num_classes), dtype=jnp.float32)
    z2 = jax.nn.softmax(
        jax.random.normal(k_z2, (batch2, num_classes), dtype=jnp.float32), axis=1)

    loss2 = jax.block_until_ready(
        value_loss(value2, z2, tile_b=128, num_parallel=2))
    ref2 = jax.block_until_ready(_reference_value_loss(value2, z2))
    assert jnp.allclose(loss2, ref2, rtol=1e-4, atol=1e-5), (loss2, ref2)

    print("KERNEL_OK")
</pallas_src>

<mosaic_0001>
module attributes {stable_mosaic.version = 11 : i64} {
  func.func @_value_loss_kernel(%arg0: i32, %arg1: i32, %arg2: memref<3x128xf32, #tpu.memory_space<vmem>>, %arg3: memref<3x128xf32, #tpu.memory_space<vmem>>, %arg4: memref<1x1x1xf32, #tpu.memory_space<vmem>>, %arg5: memref<1x128xf32, #tpu.memory_space<vmem>>) attributes {dimension_semantics = [#tpu.dimension_semantics<parallel>, #tpu.dimension_semantics<arbitrary>], iteration_bounds = array<i64: 1, 1>, scalar_prefetch = 0 : i64, scratch_operands = 1 : i64, tpu.core_type = #tpu.core_type<tc>, window_params = [{transform_indices = @transform_0, window_bounds = array<i64: 3, 128>}, {transform_indices = @transform_1, window_bounds = array<i64: 3, 128>}, {transform_indices = @transform_2, window_bounds = array<i64: 1, 1, 1>}]} {
    %c0_i32 = arith.constant 0 : i32
    %0 = arith.cmpi eq, %arg1, %c0_i32 : i32
    %1 = arith.extui %0 : i1 to i32
    %c0_i32_0 = arith.constant 0 : i32
    %2 = arith.cmpi ne, %1, %c0_i32_0 : i32
    scf.if %2 {
      %cst_14 = arith.constant 0.000000e+00 : f32
      %36 = vector.broadcast %cst_14 : f32 to vector<1x128xf32>
      %c0_15 = arith.constant 0 : index
      %c0_16 = arith.constant 0 : index
      %37 = vector.load %arg5[%c0_15, %c0_16] : memref<1x128xf32, #tpu.memory_space<vmem>>, vector<1x128xf32>
      tpu.vector_store %arg5[%c0_15, %c0_16], %36 {strides = array<i32>} : memref<1x128xf32, #tpu.memory_space<vmem>>, vector<1x128xf32>,
    } else {
    }
    %c0 = arith.constant 0 : index
    %c0_1 = arith.constant 0 : index
    %3 = vector.load %arg2[%c0, %c0_1] : memref<3x128xf32, #tpu.memory_space<vmem>>, vector<3x128xf32>
    %c0_2 = arith.constant 0 : index
    %c0_3 = arith.constant 0 : index
    %4 = vector.load %arg3[%c0_2, %c0_3] : memref<3x128xf32, #tpu.memory_space<vmem>>, vector<3x128xf32>
    %cst = arith.constant dense<0xFF800000> : vector<128xf32>
    %5 = vector.multi_reduction <maximumf>, %3, %cst [0] : vector<3x128xf32> to vector<128xf32>
    %6 = vector.shape_cast %5 : vector<128xf32> to vector<1x128xf32>
    %7 = vector.broadcast %6 : vector<1x128xf32> to vector<3x128xf32>
    %8 = arith.subf %3, %7 : vector<3x128xf32>
    %9 = math.exp %8 : vector<3x128xf32>
    %cst_4 = arith.constant dense<0.000000e+00> : vector<128xf32>
    %10 = vector.multi_reduction <add>, %9, %cst_4 [0] : vector<3x128xf32> to vector<128xf32>
    %11 = vector.shape_cast %10 : vector<128xf32> to vector<1x128xf32>
    %12 = math.log %11 : vector<1x128xf32>
    %cst_5 = arith.constant dense<0.000000e+00> : vector<128xf32>
    %13 = vector.multi_reduction <add>, %4, %cst_5 [0] : vector<3x128xf32> to vector<128xf32>
    %14 = vector.shape_cast %13 : vector<128xf32> to vector<1x128xf32>
    %15 = arith.mulf %4, %8 : vector<3x128xf32>
    %cst_6 = arith.constant dense<0.000000e+00> : vector<128xf32>
    %16 = vector.multi_reduction <add>, %15, %cst_6 [0] : vector<3x128xf32> to vector<128xf32>
    %17 = vector.shape_cast %16 : vector<128xf32> to vector<1x128xf32>
    %18 = arith.mulf %12, %14 : vector<1x128xf32>
    %19 = arith.subf %18, %17 : vector<1x128xf32>
    %c1_i32 = arith.constant 1 : i32
    %20 = arith.muli %arg0, %c1_i32 : i32
    %21 = arith.addi %20, %arg1 : i32
    %c128_i32 = arith.constant 128 : i32
    %22 = arith.muli %21, %c128_i32 : i32
    %23 = tpu.iota {dimensions = array<i32: 1>} : vector<1x128xi32>
    %24 = vector.broadcast %22 : i32 to vector<1x128xi32>
    %25 = arith.addi %24, %23 : vector<1x128xi32>
    %c8_i32 = arith.constant 8 : i32
    %26 = vector.broadcast %c8_i32 : i32 to vector<1x128xi32>
    %27 = arith.cmpi slt, %25, %26 : vector<1x128xi32>
    %cst_7 = arith.constant 0.000000e+00 : f32
    %28 = vector.broadcast %cst_7 : f32 to vector<1x128xf32>
    %29 = arith.select %27, %19, %28 : vector<1x128xi1>, vector<1x128xf32>
    %c0_8 = arith.constant 0 : index
    %c0_9 = arith.constant 0 : index
    %30 = vector.load %arg5[%c0_8, %c0_9] : memref<1x128xf32, #tpu.memory_space<vmem>>, vector<1x128xf32>
    %31 = arith.addf %30, %29 : vector<1x128xf32>
    %c0_10 = arith.constant 0 : index
    %c0_11 = arith.constant 0 : index
    %32 = vector.load %arg5[%c0_10, %c0_11] : memref<1x128xf32, #tpu.memory_space<vmem>>, vector<1x128xf32>
    tpu.vector_store %arg5[%c0_10, %c0_11], %31 {strides = array<i32>} : memref<1x128xf32, #tpu.memory_space<vmem>>, vector<1x128xf32>,
    %c0_i32_12 = arith.constant 0 : i32
    %33 = arith.cmpi eq, %arg1, %c0_i32_12 : i32
    %34 = arith.extui %33 : i1 to i32
    %c0_i32_13 = arith.constant 0 : i32
    %35 = arith.cmpi ne, %34, %c0_i32_13 : i32
    scf.if %35 {
      %c0_14 = arith.constant 0 : index
      %c0_15 = arith.constant 0 : index
      %36 = vector.load %arg5[%c0_14, %c0_15] : memref<1x128xf32, #tpu.memory_space<vmem>>, vector<1x128xf32>
      %37 = vector.shape_cast %36 : vector<1x128xf32> to vector<1x1x128xf32>
      %cst_16 = arith.constant dense<0.000000e+00> : vector<1xf32>
      %38 = vector.multi_reduction <add>, %37, %cst_16 [1, 2] : vector<1x1x128xf32> to vector<1xf32>
      %39 = vector.shape_cast %38 : vector<1xf32> to vector<1x1x1xf32>
      %40 = vector.extract %39[0, 0, 0] : f32 from vector<1x1x1xf32>
      %cst_17 = arith.constant 1.250000e-01 : f32
      %41 = arith.mulf %40, %cst_17 : f32
      %42 = vector.broadcast %41 : f32 to vector<1x1x1xf32>
      %c0_18 = arith.constant 0 : index
      %c0_19 = arith.constant 0 : index
      %c0_20 = arith.constant 0 : index
      %43 = vector.load %arg4[%c0_18, %c0_19, %c0_20] : memref<1x1x1xf32, #tpu.memory_space<vmem>>, vector<1x1x1xf32>
      tpu.vector_store %arg4[%c0_18, %c0_19, %c0_20], %42 {strides = array<i32>} : memref<1x1x1xf32, #tpu.memory_space<vmem>>, vector<1x1x1xf32>,
    } else {
    }
    return
  }
  func.func @transform_0(%arg0: i32, %arg1: i32) -> (i32, i32) {
    %c1_i32 = arith.constant 1 : i32
    %0 = arith.muli %arg0, %c1_i32 : i32
    %1 = arith.addi %0, %arg1 : i32
    %c0_i32 = arith.constant 0 : i32
    %2 = arith.minsi %1, %c0_i32 : i32
    %c0_i32_0 = arith.constant 0 : i32
    %c0_i32_1 = arith.constant 0 : i32
    return %c0_i32_0, %2 : i32, i32
  }
  func.func @transform_1(%arg0: i32, %arg1: i32) -> (i32, i32) {
    %c1_i32 = arith.constant 1 : i32
    %0 = arith.muli %arg0, %c1_i32 : i32
    %1 = arith.addi %0, %arg1 : i32
    %c0_i32 = arith.constant 0 : i32
    %2 = arith.minsi %1, %c0_i32 : i32
    %c0_i32_0 = arith.constant 0 : i32
    %c0_i32_1 = arith.constant 0 : i32
    return %c0_i32_0, %2 : i32, i32
  }
  func.func @transform_2(%arg0: i32, %arg1: i32) -> (i32, i32, i32) {
    %c0_i32 = arith.constant 0 : i32
    %c0_i32_0 = arith.constant 0 : i32
    %c0_i32_1 = arith.constant 0 : i32
    return %arg0, %c0_i32, %c0_i32_0 : i32, i32, i32
  }
}

</mosaic_0001>

<bundles_post_ra>
// kernel: value_loss.1
= control target key start
LH: loop header
LB: loop body
LE: loop exit
PB: predicated region body
PF: predicated region fallthrough
CT: control target
= control target key end

     0   :  { %vm73_vm0 = vcmask 1042432   ;;  %v198_v1 = vmov 0.0   ;;  %s237_s0 = inlined_call_operand.vmem [shape: f32[3,8], index: 0, kind: input, shape index: {}]   ;;  %s238_s1 = inlined_call_operand.vmem [shape: f32[3,8], index: 1, kind: input, shape index: {}]   ;;  %s239_s2 = inlined_call_operand.hbm [shape: f32[1,1,1], index: 2, kind: output, shape index: {}]  }
   0x1   :  { %v71_v0 = vld [vmem:[%s237_s0] sm:$0x7]  ;;  %70 = vst [vmem:[#allocation2] sm:$0x1] %v198_v1 }
   0x2   :  { %v74_v2 = vsel %vm73_vm0, %v71_v0, -inf }
   0x3   :  { %7 = vsyncpa [#allocation4], 0  ;;  %v75_v3 = vrot.slane %v74_v2, 4  ;;  %v72_v11 = vld [vmem:[%s238_s1] sm:$0x7]  ;;  %v112_v32 = vlaneseq  ;;  %vm125_vm2 = vcmask 1040384  }
   0x4   :  { %v93_v14 = vsel %vm73_vm0, %v72_v11, 0.0  ;;  %s199_s0 = smov [#allocation3]   ;;  %vm138_vm3 = vcmask 0  }
   0x5   :  { %v76_v4 = vmax.f32 %v74_v2, %v75_v3  ;;  %v94_v18 = vrot.slane %v93_v14, 4  ;;  %v113_v36 = vand.u32 127, %v112_v32  ;;  %s146_s1 = sshll.u32 %s199_s0, 4  ;;  %s147_s1 = int_to_ptr.vmem [resolvable:$true] %s146_s1 }
   0x6   :  { %s174_s15 = scalar_lea.vmem %s147_s1, 16  ;;  %s178_s16 = scalar_lea.vmem %s147_s1, 32 }
   0x7   :  { %v77_v5 = vrot.slane %v76_v4, 2  ;;  %v95_v22 = vadd.f32 %v94_v18, %v93_v14  ;;  %vm116_vm1 = vcmp.lt.s32.totalorder %v113_v36, 8  ;;  %p175_p0 = scmp.ne.s32.totalorder %s147_s1, %s174_s15  ;;  %p179_p1 = scmp.lt.s32.totalorder %s147_s1, %s147_s1 }
   0x8   :  { %v118_v41 = vld [vmem:[#allocation2] sm:$0x1]  ;;  %p180_p2 = scmp.lt.s32.totalorder %s178_s16, %s174_s15 }
   0x9   :  { %v78_v6 = vmax.f32 %v76_v4, %v77_v5  ;;  %v96_v26 = vrot.slane %v95_v22, 2 }
   0xa   :  { %p181_p3 = por %p180_p2, %p179_p1 }
   0xb   :  { %v79_v7 = vrot.slane %v78_v6, 1  ;;  %v97_v29 = vadd.f32 %v96_v26, %v95_v22 }
   0xc   :  { %p182_p4 = pnand %p181_p3, %p175_p0 }
   0xd   :  { %v80_v8 = vmax.f32 %v78_v6, %v79_v7  ;;  %v98_v31 = vrot.slane %v97_v29, 1 }
   0xf   :  { %v81_v9 = vsub.f32 %v71_v0, %v80_v8  ;;  %v99_v34 = vadd.f32 %v98_v31, %v97_v29 }
  0x11   :  { %v82_v10 = vmul.f32 1.442695, %v81_v9  ;;  %v100_v12 = vmul.f32 %v81_v9, %v72_v11 }
  0x13   :  { %170 = vpow2.f32 %v82_v10  ;;  %v101_v17 = vsel %vm73_vm0, %v100_v12, 0.0 }
  0x14   :  { %v102_v20 = vrot.slane %v101_v17, 4 }
  0x16   :  { %v103_v24 = vadd.f32 %v102_v20, %v101_v17 }
  0x18   :  { %v104_v28 = vrot.slane %v103_v24, 2 }
  0x1a   :  { %v105_v30 = vadd.f32 %v104_v28, %v103_v24 }
  0x1c   :  { %v106_v33 = vrot.slane %v105_v30, 1 }
  0x1d   :  { %v171_v13 = vpop.eup %170 }
  0x1e   :  { %v84_v15 = vsel %vm73_vm0, %v171_v13, 0.0  ;;  %v107_v38 = vadd.f32 %v106_v33, %v105_v30 }
  0x1f   :  { %v85_v16 = vrot.slane %v84_v15, 4 }
  0x21   :  { %v86_v19 = vadd.f32 %v85_v16, %v84_v15 }
  0x23   :  { %v87_v21 = vrot.slane %v86_v19, 2 }
  0x25   :  { %v88_v23 = vadd.f32 %v87_v21, %v86_v19 }
  0x27   :  { %v89_v25 = vrot.slane %v88_v23, 1 }
  0x29   :  { %v90_v27 = vadd.f32 %v89_v25, %v88_v23 }
  0x2b   :  { %172 = vlog2.f32 %v90_v27 }
  0x35   :  { %v173_v35 = vpop.eup %172 }
  0x36   :  { %v92_v37 = vmul.f32 0.6931472, %v173_v35 }
  0x38   :  { %v108_v39 = vmul.f32 %v99_v34, %v92_v37 }
  0x3a   :  { %v109_v40 = vsub.f32 %v108_v39, %v107_v38 }
  0x3c   :  { %v117_v42 = vsel %vm116_vm1, %v109_v40, 0.0 }
  0x3d   :  { %v119_v43 = vadd.f32 %v118_v41, %v117_v42 }
  0x3f   :  { %120 = vst [vmem:[#allocation2] sm:$0x1] %v119_v43 }
  0x46   :  { %v124_v44 = vld [vmem:[#allocation2] sm:$0x1] }
  0x47   :  { %v126_v45 = vsel %vm125_vm2, %v124_v44, 0.0 }
  0x48   :  { %127 = vadd.xlane.f32.xlu0 %v126_v45 }
  0xd5   :  { %v128_v46 = vpop.xlane.xlu0 %127 }
  0xd6   :  { %v129_v47 = vrot.slane %v128_v46, 4 }
  0xd8   :  { %v130_v48 = vadd.f32 %v129_v47, %v128_v46 }
  0xda   :  { %v131_v49 = vrot.slane %v130_v48, 2 }
  0xdc   :  { %v132_v50 = vadd.f32 %v131_v49, %v130_v48 }
  0xde   :  { %v133_v51 = vrot.slane %v132_v50, 1 }
  0xe0   :  { %v134_v52 = vadd.f32 %v133_v51, %v132_v50 }
  0xe2   :  { %166 = vpush %v134_v52 }
 0x113   :  { %s167_s13 = spop %166 }
 0x114   :  { %s136_s14 = smul.f32 0.125, %s167_s13 }
 0x116   :  { %v137_v53 = vstv %s136_s14 }
 0x117   :  { %139 = vst.msk [vmem:[#allocation3] sm:$0x1] %vm138_vm3, %v137_v53 }
 0x118   :  { %185 = shalt.err (!%p182_p4)
}
 0x119   :  { %s186_s19 = scalar_lea.hbm %s239_s2, 16 }
 0x11a   :  { %p187_p5 = scmp.ne.s32.totalorder %s239_s2, %s186_s19  ;;  %p190_p6 = scmp.lt.u32.totalorder %s186_s19, %s239_s2 }
 0x11c   :  { %p192_p7 = pnand %p190_p6, %p187_p5 }
 0x11e   :  { %195 = shalt.err (!%p192_p7)
}
 0x11f   :  { %149 = dma.vmem_to_hbm [thread:$0]  %s147_s1, 16, %s239_s2, [#allocation4]  }
 0x120   :  { %196 = dma.done.wait [#allocation4], 16  }
 0x121   :  { %197 = vsyncadd [#allocation4], 4294967280 }
 0x122   :  { %153 = vsyncpa [#allocation4], 1 }

</bundles_post_ra>
